<compile_context>
chip_gen: v7x
topology: tpu7x:2x2x1
jax: 0.10.0
libtpu: 0.0.40
codegen_flags: <defaults>
</compile_context>

<pallas_src>
import jax
import jax.numpy as jnp
import numpy as np
from jax.experimental import pallas as pl
from jax.experimental.pallas import tpu as pltpu

_LANES = 128


def linear_kernel(wb_ref, x_ref, o_ref):
    # wb_ref: (2,) in SMEM -> [weight, bias]; x_ref/o_ref: (rows_blk, 128) in VMEM.
    w = wb_ref[0]
    b = wb_ref[1]
    # Pure VPU elementwise multiply-add; only vld/vst slots are exercised.
    o_ref[...] = x_ref[...] * w + b


def linear_forward(x, weight, bias, *, block_rows=4096):
    """Pallas equivalent of nn.Linear(in_features=1, out_features=1) forward."""
    n, in_f = x.shape
    out_f = weight.shape[0]
    assert in_f == 1 and out_f == 1, "Net.fc1 is Linear(1, 1)"

    dtype = x.dtype
    itemsize = np.dtype(dtype).itemsize
    # Minimum sublane multiple for the dtype's packed tile: 8 (f32), 16 (bf16), 32 (int8).
    min_sublanes = max(8, 32 // itemsize)

    # ---- lane-dense re-layout: (N, 1) -> (rows, 128), minimal padding ----
    xf = x.reshape(-1)                      # free (contiguous reshape)
    rows = pl.cdiv(n, _LANES)
    n_padded = rows * _LANES
    needs_pad = n_padded != n
    if needs_pad:
        # Pads at most 127 elements; only paid when N % 128 != 0.
        xf = jnp.pad(xf, (0, n_padded - n))
    x2 = xf.reshape(rows, _LANES)

    # ---- block size selection ----
    if rows <= block_rows:
        # Single block covering the full row extent (always a legal block shape).
        rows_blk = rows
    else:
        rows_blk = max((block_rows // min_sublanes) * min_sublanes, min_sublanes)

    grid = (pl.cdiv(rows, rows_blk),)       # partial last block handled by Pallas

    wb = jnp.concatenate([weight.reshape(-1), bias.reshape(-1)]).astype(dtype)

    out2 = pl.pallas_call(
        linear_kernel,
        out_shape=jax.ShapeDtypeStruct((rows, _LANES), dtype),
        grid=grid,
        in_specs=[
            # packed [weight, bias] scalars in SMEM.
            pl.BlockSpec(memory_space=pltpu.MemorySpace.SMEM),
            # lane-dense ~2 MiB input tiles over the row axis.
            pl.BlockSpec((rows_blk, _LANES), lambda i: (i, 0)),
        ],
        out_specs=pl.BlockSpec((rows_blk, _LANES), lambda i: (i, 0)),
        compiler_params=pltpu.CompilerParams(
            dimension_semantics=("parallel",),
        ),
    )(wb, x2)

    # Undo the (minimal) re-layout back to (N, 1).
    yf = out2.reshape(-1)
    if needs_pad:
        yf = yf[:n]
    return yf.reshape(n, out_f)


if __name__ == "__main__":
    key = jax.random.PRNGKey(0)
    kx, kw, kb, kx2, kx3 = jax.random.split(key, 5)

    weight = jax.random.normal(kw, (1, 1), dtype=jnp.float32) * 0.5
    bias = jax.random.normal(kb, (1,), dtype=jnp.float32) * 0.1

    # Small deterministic example matching Linear(1, 1): batch of 8 scalar samples.
    N = 8
    x = jax.random.normal(kx, (N, 1), dtype=jnp.float32)
    y = jax.block_until_ready(linear_forward(x, weight, bias))
    y_ref = x @ weight.T + bias
    assert y.shape == (N, 1)
    assert jnp.allclose(y, y_ref, atol=1e-6), "mismatch vs reference (N=8)"

    # Exercise the no-pad fast path (N a multiple of 128, single block).
    N2 = 1280
    x2 = jax.random.normal(kx2, (N2, 1), dtype=jnp.float32)
    y2 = jax.block_until_ready(linear_forward(x2, weight, bias))
    y2_ref = x2 @ weight.T + bias
    assert y2.shape == (N2, 1)
    assert jnp.allclose(y2, y2_ref, atol=1e-6), "mismatch vs reference (N=1280)"

    # Exercise multi-block grid + partial last block + lane padding (N % 128 != 0).
    N3 = 2048 + 37
    x3 = jax.random.normal(kx3, (N3, 1), dtype=jnp.float32)
    y3 = jax.block_until_ready(linear_forward(x3, weight, bias, block_rows=16))
    y3_ref = x3 @ weight.T + bias
    assert y3.shape == (N3, 1)
    assert jnp.allclose(y3, y3_ref, atol=1e-6), "mismatch vs reference (N=2085)"

    print("KERNEL_OK")
</pallas_src>

<mosaic_0001>
module attributes {stable_mosaic.version = 11 : i64} {
  func.func @linear_kernel(%arg0: i32, %arg1: memref<2xf32, #tpu.memory_space<smem>>, %arg2: memref<1x128xf32, #tpu.memory_space<vmem>>, %arg3: memref<1x128xf32, #tpu.memory_space<vmem>>) attributes {dimension_semantics = [#tpu.dimension_semantics<parallel>], iteration_bounds = array<i64: 1>, scalar_prefetch = 0 : i64, scratch_operands = 0 : i64, tpu.core_type = #tpu.core_type<tc>, window_params = [{transform_indices = @transform_0, window_bounds = array<i64: 2>}, {transform_indices = @transform_1, window_bounds = array<i64: 1, 128>}, {transform_indices = @transform_2, window_bounds = array<i64: 1, 128>}]} {
    %c0 = arith.constant 0 : index
    %0 = memref.load %arg1[%c0] : memref<2xf32, #tpu.memory_space<smem>>
    %c1 = arith.constant 1 : index
    %1 = memref.load %arg1[%c1] : memref<2xf32, #tpu.memory_space<smem>>
    %c0_0 = arith.constant 0 : index
    %c0_1 = arith.constant 0 : index
    %2 = vector.load %arg2[%c0_0, %c0_1] : memref<1x128xf32, #tpu.memory_space<vmem>>, vector<1x128xf32>
    %3 = vector.broadcast %0 : f32 to vector<1x128xf32>
    %4 = arith.mulf %2, %3 : vector<1x128xf32>
    %5 = vector.broadcast %1 : f32 to vector<1x128xf32>
    %6 = arith.addf %4, %5 : vector<1x128xf32>
    %c0_2 = arith.constant 0 : index
    %c0_3 = arith.constant 0 : index
    %7 = vector.load %arg3[%c0_2, %c0_3] : memref<1x128xf32, #tpu.memory_space<vmem>>, vector<1x128xf32>
    tpu.vector_store %arg3[%c0_2, %c0_3], %6 {strides = array<i32>} : memref<1x128xf32, #tpu.memory_space<vmem>>, vector<1x128xf32>,
    return
  }
  func.func @transform_0(%arg0: i32) -> i32 {
    %c0_i32 = arith.constant 0 : i32
    %c0_i32_0 = arith.constant 0 : i32
    return %c0_i32 : i32
  }
  func.func @transform_1(%arg0: i32) -> (i32, i32) {
    %c0_i32 = arith.constant 0 : i32
    %c0_i32_0 = arith.constant 0 : i32
    return %arg0, %c0_i32 : i32, i32
  }
  func.func @transform_2(%arg0: i32) -> (i32, i32) {
    %c0_i32 = arith.constant 0 : i32
    %c0_i32_0 = arith.constant 0 : i32
    return %arg0, %c0_i32 : i32, i32
  }
}

</mosaic_0001>

<bundles_post_ra>
// kernel: tpu_custom_call.1
= control target key start
LH: loop header
LB: loop body
LE: loop exit
PB: predicated region body
PF: predicated region fallthrough
CT: control target
= control target key end

     0   :  { %7 = vsyncpa [#allocation4], 0  ;;  %s129_s0 = inlined_call_operand.hbm [shape: f32[2], index: 0, kind: input, shape index: {}]   ;;  %s130_s1 = inlined_call_operand.vmem [shape: f32[1,128], index: 1, kind: input, shape index: {}]   ;;  %s131_s2 = inlined_call_operand.hbm [shape: f32[1,128], index: 2, kind: output, shape index: {}]  }
   0x1   :  { %8 = vsyncpa [#allocation3], 0  ;;  %s49_s11 = scalar_lea.hbm %s129_s0, 16 }
   0x2   :  { %p50_p0 = scmp.ne.s32.totalorder %s129_s0, %s49_s11  ;;  %p53_p1 = scmp.lt.u32.totalorder %s49_s11, %s129_s0 }
   0x4   :  { %p55_p2 = pnand %p53_p1, %p50_p0 }
   0x6   :  { %58 = shalt.err (!%p55_p2)
}
   0x7   :  { %s85_s16 = smov [#allocation2]  }
   0x8   :  { %16 = dma.hbm_to_smem %s129_s0, 16, %s85_s16, [#allocation4]  }
   0x9   :  { %81 = dma.done.wait [#allocation4], 16  }
   0xa   :  { %82 = vsyncadd [#allocation4], 4294967280 }
   0xb   :  { %22 = sfence }
   0xc   :  { %s23_s19 = sld [smem:[#allocation2]]  ;;  %s46_s20 = sld [smem:[#allocation2 + $0x1]]  ;;  %v25_v0 = vld [vmem:[%s130_s1] sm:$0x1] }
   0xd   :  { %s86_s23 = smov [#allocation5]  }
   0xe   :  { %s37_s24 = sshll.u32 %s86_s23, 4  ;;  %s38_s24 = int_to_ptr.vmem [resolvable:$true] %s37_s24 }
   0xf   :  { %s59_s25 = scalar_lea.vmem %s38_s24, 16  ;;  %s63_s0 = scalar_lea.vmem %s38_s24, 32 }
  0x10   :  { %p60_p3 = scmp.ne.s32.totalorder %s38_s24, %s59_s25  ;;  %p64_p4 = scmp.lt.s32.totalorder %s38_s24, %s38_s24 }
  0x11   :  { %p65_p5 = scmp.lt.s32.totalorder %s63_s0, %s59_s25 }
  0x12   :  { %v26_v1 = vstv %s23_s19  ;;  %v28_v2 = vstv %s46_s20 }
  0x13   :  { %v27_v3 = vmul.f32 %v26_v1, %v25_v0  ;;  %p66_p6 = por %p65_p5, %p64_p4 }
  0x15   :  { %v29_v4 = vadd.f32 %v28_v2, %v27_v3  ;;  %p67_p7 = pnand %p66_p6, %p60_p3 }
  0x17   :  { %30 = vst [vmem:[#allocation5] sm:$0x1] %v29_v4 }
  0x18   :  { %70 = shalt.err (!%p67_p7)
}
  0x19   :  { %s71_s1 = scalar_lea.hbm %s131_s2, 16 }
  0x1a   :  { %p72_p8 = scmp.ne.s32.totalorder %s131_s2, %s71_s1  ;;  %p75_p9 = scmp.lt.u32.totalorder %s71_s1, %s131_s2 }
  0x1c   :  { %p77_p10 = pnand %p75_p9, %p72_p8 }
  0x1e   :  { %80 = shalt.err (!%p77_p10)
}
  0x1f   :  { %40 = dma.vmem_to_hbm [thread:$0]  %s38_s24, 16, %s131_s2, [#allocation3]  }
  0x20   :  { %83 = dma.done.wait [#allocation3], 16  }
  0x21   :  { %84 = vsyncadd [#allocation3], 4294967280 }
  0x22   :  { %44 = vsyncpa [#allocation3], 1 }
  0x23   :  { %45 = vsyncpa [#allocation4], 1 }

</bundles_post_ra>
